<compile_context>
chip_gen: v6e
topology: v6e:2x2x1
jax: 0.10.0
libtpu: 0.0.40
codegen_flags: <defaults>
</compile_context>

<pallas_src>
import jax
import jax.numpy as jnp
from jax import lax
from jax.experimental import pallas as pl
from jax.experimental.pallas import tpu as pltpu


def _round_up(n, m):
    return ((n + m - 1) // m) * m


def _vmem_capacity_bytes():
    """Best-effort physical VMEM capacity; conservative (v7x, 64 MiB) fallback."""
    try:
        info = pltpu.get_tpu_info()
        cap = getattr(info, "vmem_capacity_bytes", None)
        if cap:
            return int(cap)
    except Exception:
        pass
    return 64 * 1024 * 1024


def _tensorcores_per_device():
    """Best-effort TensorCores-per-device (v7x megacore = 2).  Defaults to 1."""
    try:
        dev = jax.devices()[0]
        for attr in ("num_cores", "core_count"):
            v = getattr(dev, attr, None)
            if isinstance(v, int) and 1 <= v <= 8:
                return v
        kind = (getattr(dev, "device_kind", "") or "").lower()
        if "v7" in kind:
            return 2
    except Exception:
        pass
    return 1


def log_stft_magnitude_loss(x_mag, y_mag, *, max_block_bytes=None,
                            sub_rows_target=256):
    """Log STFT magnitude loss (scalar), matching F.l1_loss(log(y), log(x)).

    Inputs are (B, #frames, #freq_bins); flattened (free reshape) to
    (B*frames, freq_bins) so freq_bins maps to the TPU lane axis.  Freq bins
    are NOT padded (block last dim = full F); ragged rows are masked in-kernel.
    """
    assert x_mag.shape == y_mag.shape
    B, T, F = x_mag.shape
    R = B * T
    n_elems = R * F

    dtype = x_mag.dtype
    itemsize = jnp.dtype(dtype).itemsize

    # ---- generation-aware VMEM budget ------------------------------------
    vmem_cap = _vmem_capacity_bytes()
    vmem_limit = int(min(vmem_cap * 3 // 4, 100 * 1024 * 1024))
    if max_block_bytes is None:
        # 2 inputs x 2 pipeline buffers + (8,F) accumulator + sub-chunk f32
        # temporaries must fit comfortably under vmem_limit.
        max_block_bytes = int(min(8 * 1024 * 1024,
                                  max(512 * 1024, (vmem_limit - (8 << 20)) // 4)))

    # ---- row tiling (no padding of either axis) ---------------------------
    tile_rows = max(32, (max_block_bytes // (F * itemsize) // 32) * 32)
    tile_rows = min(tile_rows, _round_up(R, 32))
    if tile_rows > sub_rows_target:
        sub_rows = sub_rows_target
        tile_rows = (tile_rows // sub_rows) * sub_rows
    else:
        sub_rows = tile_rows
    n_sub = tile_rows // sub_rows
    unroll_sub = n_sub <= 4

    nblocks = pl.cdiv(R, tile_rows)
    # Split row-blocks across TensorCores only when the device has more than
    # one (v7x); single-TC v5e/v6e stay at P=1 (no redundant HBM reads).
    P = max(1, min(_tensorcores_per_device(), nblocks))
    steps = pl.cdiv(nblocks, P)

    x2 = x_mag.reshape(R, F)
    y2 = y_mag.reshape(R, F)

    def in_map(p, i):
        # Clamp so no block window starts past the array; redundant blocks and
        # tail rows are masked to zero inside the kernel (no input padding).
        return (jnp.minimum(p * steps + i, nblocks - 1), 0)

    in_spec = pl.BlockSpec((tile_rows, F), in_map)

    def kernel(x_ref, y_ref, acc_ref):
        p = pl.program_id(0)
        i = pl.program_id(1)

        @pl.when(i == 0)
        def _init():
            acc_ref[...] = jnp.zeros_like(acc_ref)

        blk = p * steps + i                  # unclamped linear block id
        row_start = blk * tile_rows          # global row of this tile's first row

        def make_body(mask_rows):
            def body(s, carry):
                r0 = pl.multiple_of(s * sub_rows, sub_rows)
                x = x_ref[pl.ds(r0, sub_rows), :].astype(jnp.float32)
                y = y_ref[pl.ds(r0, sub_rows), :].astype(jnp.float32)
                # Two-log form matches F.l1_loss(log(y), log(x)) exactly and
                # stays finite even when x is tiny relative to y.
                d = jnp.abs(jnp.log(y) - jnp.log(x))
                if mask_rows:
                    rows = (row_start + r0
                            + lax.broadcasted_iota(jnp.int32, (sub_rows, 1), 0))
                    d = jnp.where(rows < R, d, 0.0)
                # Fold (sub_rows, F) -> (sub_rows//8, 8, F) and sum the leading
                # axis: pure VPU adds (split is along sublane-tile boundaries),
                # no XLU cross-lane reduce on the hot path.
                acc_ref[...] += jnp.sum(d.reshape(sub_rows // 8, 8, F), axis=0)
                return carry
            return body

        # Only the ragged tail block (or a redundant megacore block) pays for
        # the row mask; full interior blocks take the lean path.
        needs_mask = (blk + 1) * tile_rows > R

        def run(mask_rows):
            lax.fori_loop(0, n_sub, make_body(mask_rows), 0, unroll=unroll_sub)

        @pl.when(jnp.logical_not(needs_mask))
        def _full():
            run(False)

        @pl.when(needs_mask)
        def _tail():
            run(True)

    cost = pl.CostEstimate(
        flops=5 * n_elems,
        transcendentals=2 * n_elems,
        bytes_accessed=2 * n_elems * itemsize + P * 8 * F * 4,
    )

    partials = pl.pallas_call(
        kernel,
        out_shape=jax.ShapeDtypeStruct((P, 8, F), jnp.float32),
        grid_spec=pltpu.PrefetchScalarGridSpec(
            num_scalar_prefetch=0,
            grid=(P, steps),
            in_specs=[in_spec, in_spec],
            out_specs=pl.BlockSpec((None, 8, F), lambda p, i: (p, 0, 0)),
        ),
        compiler_params=pltpu.CompilerParams(
            dimension_semantics=("parallel", "arbitrary"),
            vmem_limit_bytes=vmem_limit,
        ),
        cost_estimate=cost,
    )(x2, y2)

    # Final tiny cross-lane reduce + mean (true element count) in plain JAX.
    return jnp.sum(partials) / jnp.float32(n_elems)


if __name__ == "__main__":
    key = jax.random.PRNGKey(0)

    def ref_loss(x, y):
        xf = x.astype(jnp.float32)
        yf = y.astype(jnp.float32)
        return jnp.mean(jnp.abs(jnp.log(yf) - jnp.log(xf)))

    # (B, #frames, #freq_bins):
    #   1) aligned rows / lane-aligned freq bins
    #   2) ragged rows and ragged freq bins (partial block, in-kernel mask)
    #   3) bf16 streaming path
    #   4) small forced block size -> multi-block reduction grid + tail mask
    cases = [
        ((2, 16, 128), jnp.float32, None),
        ((2, 13, 100), jnp.float32, None),
        ((2, 16, 128), jnp.bfloat16, None),
        ((3, 50, 129), jnp.float32, 64 * 1024),
    ]

    for idx, (shape, dt, blk) in enumerate(cases):
        kx, ky = jax.random.split(jax.random.fold_in(key, idx))
        x_mag = (jnp.abs(jax.random.normal(kx, shape, dtype=jnp.float32)) + 1e-3).astype(dt)
        y_mag = (jnp.abs(jax.random.normal(ky, shape, dtype=jnp.float32)) + 1e-3).astype(dt)

        kwargs = {} if blk is None else {"max_block_bytes": blk}
        loss = log_stft_magnitude_loss(x_mag, y_mag, **kwargs)
        jax.block_until_ready(loss)

        ref = ref_loss(x_mag, y_mag)
        assert jnp.allclose(loss, ref, rtol=1e-5, atol=1e-5), (shape, dt, loss, ref)

    print("KERNEL_OK")
</pallas_src>

<mosaic_0001>
module attributes {stable_mosaic.version = 11 : i64} {
  func.func @kernel(%arg0: i32, %arg1: i32, %arg2: memref<32x128xf32, #tpu.memory_space<vmem>>, %arg3: memref<32x128xf32, #tpu.memory_space<vmem>>, %arg4: memref<1x8x128xf32, #tpu.memory_space<vmem>>) attributes {dimension_semantics = [#tpu.dimension_semantics<parallel>, #tpu.dimension_semantics<arbitrary>], iteration_bounds = array<i64: 1, 1>, scalar_prefetch = 0 : i64, scratch_operands = 0 : i64, tpu.core_type = #tpu.core_type<tc>, window_params = [{transform_indices = @transform_0, window_bounds = array<i64: 32, 128>}, {transform_indices = @transform_1, window_bounds = array<i64: 32, 128>}, {transform_indices = @transform_2, window_bounds = array<i64: 1, 8, 128>}]} {
    %c0_i32 = arith.constant 0 : i32
    %0 = arith.cmpi eq, %arg1, %c0_i32 : i32
    %1 = arith.extui %0 : i1 to i32
    %c0_i32_0 = arith.constant 0 : i32
    %2 = arith.cmpi ne, %1, %c0_i32_0 : i32
    scf.if %2 {
      %cst = arith.constant 0.000000e+00 : f32
      %14 = vector.broadcast %cst : f32 to vector<8x128xf32>
      %c0 = arith.constant 0 : index
      %c0_6 = arith.constant 0 : index
      %c0_7 = arith.constant 0 : index
      %15 = vector.load %arg4[%c0, %c0_6, %c0_7] : memref<1x8x128xf32, #tpu.memory_space<vmem>>, vector<1x8x128xf32>
      %16 = vector.shape_cast %15 : vector<1x8x128xf32> to vector<8x128xf32>
      %17 = vector.shape_cast %14 : vector<8x128xf32> to vector<1x8x128xf32>
      tpu.vector_store %arg4[%c0, %c0_6, %c0_7], %17 {strides = array<i32>} : memref<1x8x128xf32, #tpu.memory_space<vmem>>, vector<1x8x128xf32>,
    } else {
    }
    %c1_i32 = arith.constant 1 : i32
    %3 = arith.muli %arg0, %c1_i32 : i32
    %4 = arith.addi %3, %arg1 : i32
    %c32_i32 = arith.constant 32 : i32
    %5 = arith.muli %4, %c32_i32 : i32
    %c1_i32_1 = arith.constant 1 : i32
    %6 = arith.addi %4, %c1_i32_1 : i32
    %c32_i32_2 = arith.constant 32 : i32
    %7 = arith.muli %6, %c32_i32_2 : i32
    %c32_i32_3 = arith.constant 32 : i32
    %8 = arith.cmpi sgt, %7, %c32_i32_3 : i32
    %true = arith.constant true
    %9 = arith.xori %8, %true : i1
    %10 = arith.extui %9 : i1 to i32
    %c0_i32_4 = arith.constant 0 : i32
    %11 = arith.cmpi ne, %10, %c0_i32_4 : i32
    scf.if %11 {
      %c0_i32_6 = arith.constant 0 : i32
      %c32_i32_7 = arith.constant 32 : i32
      %14 = arith.muli %c0_i32_6, %c32_i32_7 : i32
      %15 = tpu.assume_multiple %14, 32 : i32
      %16 = arith.index_cast %15 : i32 to index
      %c0 = arith.constant 0 : index
      %17 = vector.load %arg2[%16, %c0] : memref<32x128xf32, #tpu.memory_space<vmem>>, vector<32x128xf32>
      %18 = arith.index_cast %15 : i32 to index
      %c0_8 = arith.constant 0 : index
      %19 = vector.load %arg3[%18, %c0_8] : memref<32x128xf32, #tpu.memory_space<vmem>>, vector<32x128xf32>
      %20 = math.log %19 : vector<32x128xf32>
      %21 = math.log %17 : vector<32x128xf32>
      %22 = arith.subf %20, %21 : vector<32x128xf32>
      %23 = math.absf %22 : vector<32x128xf32>
      %c0_9 = arith.constant 0 : index
      %c0_10 = arith.constant 0 : index
      %c0_11 = arith.constant 0 : index
      %24 = vector.load %arg4[%c0_9, %c0_10, %c0_11] : memref<1x8x128xf32, #tpu.memory_space<vmem>>, vector<1x8x128xf32>
      %25 = vector.shape_cast %24 : vector<1x8x128xf32> to vector<8x128xf32>
      %26 = vector.shape_cast %23 : vector<32x128xf32> to vector<4x8x128xf32>
      %cst = arith.constant dense<0.000000e+00> : vector<8x128xf32>
      %27 = vector.multi_reduction <add>, %26, %cst [0] : vector<4x8x128xf32> to vector<8x128xf32>
      %28 = arith.addf %25, %27 : vector<8x128xf32>
      %c0_12 = arith.constant 0 : index
      %c0_13 = arith.constant 0 : index
      %c0_14 = arith.constant 0 : index
      %29 = vector.load %arg4[%c0_12, %c0_13, %c0_14] : memref<1x8x128xf32, #tpu.memory_space<vmem>>, vector<1x8x128xf32>
      %30 = vector.shape_cast %29 : vector<1x8x128xf32> to vector<8x128xf32>
      %31 = vector.shape_cast %28 : vector<8x128xf32> to vector<1x8x128xf32>
      tpu.vector_store %arg4[%c0_12, %c0_13, %c0_14], %31 {strides = array<i32>} : memref<1x8x128xf32, #tpu.memory_space<vmem>>, vector<1x8x128xf32>,
      %c1_i32_15 = arith.constant 1 : i32
    } else {
    }
    %12 = arith.extui %8 : i1 to i32
    %c0_i32_5 = arith.constant 0 : i32
    %13 = arith.cmpi ne, %12, %c0_i32_5 : i32
    scf.if %13 {
      %c0_i32_6 = arith.constant 0 : i32
      %c32_i32_7 = arith.constant 32 : i32
      %14 = arith.muli %c0_i32_6, %c32_i32_7 : i32
      %15 = tpu.assume_multiple %14, 32 : i32
      %16 = arith.index_cast %15 : i32 to index
      %c0 = arith.constant 0 : index
      %17 = vector.load %arg2[%16, %c0] : memref<32x128xf32, #tpu.memory_space<vmem>>, vector<32x128xf32>
      %18 = arith.index_cast %15 : i32 to index
      %c0_8 = arith.constant 0 : index
      %19 = vector.load %arg3[%18, %c0_8] : memref<32x128xf32, #tpu.memory_space<vmem>>, vector<32x128xf32>
      %20 = math.log %19 : vector<32x128xf32>
      %21 = math.log %17 : vector<32x128xf32>
      %22 = arith.subf %20, %21 : vector<32x128xf32>
      %23 = math.absf %22 : vector<32x128xf32>
      %24 = arith.addi %5, %15 : i32
      %25 = tpu.iota {dimensions = array<i32: 0>} : vector<32x1xi32>
      %26 = vector.broadcast %24 : i32 to vector<32x1xi32>
      %27 = arith.addi %26, %25 : vector<32x1xi32>
      %c32_i32_9 = arith.constant 32 : i32
      %28 = vector.broadcast %c32_i32_9 : i32 to vector<32x1xi32>
      %29 = arith.cmpi slt, %27, %28 : vector<32x1xi32>
      %cst = arith.constant 0.000000e+00 : f32
      %30 = vector.shape_cast %29 : vector<32x1xi1> to vector<32x1xi1>
      %31 = vector.broadcast %30 : vector<32x1xi1> to vector<32x128xi1>
      %32 = vector.broadcast %cst : f32 to vector<32x128xf32>
      %33 = arith.select %31, %23, %32 : vector<32x128xi1>, vector<32x128xf32>
      %c0_10 = arith.constant 0 : index
      %c0_11 = arith.constant 0 : index
      %c0_12 = arith.constant 0 : index
      %34 = vector.load %arg4[%c0_10, %c0_11, %c0_12] : memref<1x8x128xf32, #tpu.memory_space<vmem>>, vector<1x8x128xf32>
      %35 = vector.shape_cast %34 : vector<1x8x128xf32> to vector<8x128xf32>
      %36 = vector.shape_cast %33 : vector<32x128xf32> to vector<4x8x128xf32>
      %cst_13 = arith.constant dense<0.000000e+00> : vector<8x128xf32>
      %37 = vector.multi_reduction <add>, %36, %cst_13 [0] : vector<4x8x128xf32> to vector<8x128xf32>
      %38 = arith.addf %35, %37 : vector<8x128xf32>
      %c0_14 = arith.constant 0 : index
      %c0_15 = arith.constant 0 : index
      %c0_16 = arith.constant 0 : index
      %39 = vector.load %arg4[%c0_14, %c0_15, %c0_16] : memref<1x8x128xf32, #tpu.memory_space<vmem>>, vector<1x8x128xf32>
      %40 = vector.shape_cast %39 : vector<1x8x128xf32> to vector<8x128xf32>
      %41 = vector.shape_cast %38 : vector<8x128xf32> to vector<1x8x128xf32>
      tpu.vector_store %arg4[%c0_14, %c0_15, %c0_16], %41 {strides = array<i32>} : memref<1x8x128xf32, #tpu.memory_space<vmem>>, vector<1x8x128xf32>,
      %c1_i32_17 = arith.constant 1 : i32
    } else {
    }
    return
  }
  func.func @transform_0(%arg0: i32, %arg1: i32) -> (i32, i32) {
    %c1_i32 = arith.constant 1 : i32
    %0 = arith.muli %arg0, %c1_i32 : i32
    %1 = arith.addi %0, %arg1 : i32
    %c0_i32 = arith.constant 0 : i32
    %2 = arith.minsi %1, %c0_i32 : i32
    %c0_i32_0 = arith.constant 0 : i32
    %c0_i32_1 = arith.constant 0 : i32
    return %2, %c0_i32_0 : i32, i32
  }
  func.func @transform_1(%arg0: i32, %arg1: i32) -> (i32, i32) {
    %c1_i32 = arith.constant 1 : i32
    %0 = arith.muli %arg0, %c1_i32 : i32
    %1 = arith.addi %0, %arg1 : i32
    %c0_i32 = arith.constant 0 : i32
    %2 = arith.minsi %1, %c0_i32 : i32
    %c0_i32_0 = arith.constant 0 : i32
    %c0_i32_1 = arith.constant 0 : i32
    return %2, %c0_i32_0 : i32, i32
  }
  func.func @transform_2(%arg0: i32, %arg1: i32) -> (i32, i32, i32) {
    %c0_i32 = arith.constant 0 : i32
    %c0_i32_0 = arith.constant 0 : i32
    %c0_i32_1 = arith.constant 0 : i32
    return %arg0, %c0_i32, %c0_i32_0 : i32, i32, i32
  }
}

</mosaic_0001>

<bundles_post_ra>
// kernel: tpu_custom_call.1
= control target key start
LH: loop header
LB: loop body
LE: loop exit
PB: predicated region body
PF: predicated region fallthrough
CT: control target
= control target key end

     0   :  { %7 = vsyncpa [#allocation3], 0  ;;  %s317_s0 = inlined_call_operand.hbm [shape: f32[32,128], index: 0, kind: input, shape index: {}]   ;;  %s318_s1 = inlined_call_operand.hbm [shape: f32[32,128], index: 1, kind: input, shape index: {}]   ;;  %s319_s2 = inlined_call_operand.hbm [shape: f32[1,8,128], index: 2, kind: output, shape index: {}]  }
   0x1   :  { %8 = vsyncpa [#allocation6], 0 }
   0x2   :  { %9 = vsyncpa [#allocation4], 0  ;;  %s288_s9 = smov [#allocation2]  }
   0x3   :  { %s21_s10 = sshll.u32 %s288_s9, 4  ;;  %s22_s10 = int_to_ptr.vmem [resolvable:$true] %s21_s10 }
   0x4   :  { %s230_s11 = scalar_lea.vmem %s22_s10, 512  ;;  %p235_p1 = scmp.lt.s32.totalorder %s22_s10, %s22_s10 }
   0x5   :  { %p231_p0 = scmp.ne.s32.totalorder %s22_s10, %s230_s11  ;;  %p236_p2 = scmp.lt.s32.totalorder %s230_s11, %s230_s11 }
   0x7   :  { %p237_p3 = por %p236_p2, %p235_p1 }
   0x9   :  { %p238_p4 = pnand %p237_p3, %p231_p0 }
   0xb   :  { %241 = shalt.err (!%p238_p4)
}
   0xc   :  { %s289_s12 = smov 128   ;;  %s290_s13 = smov 8  }
   0xd   :  { %27 = dma.hbm_to_vmem [thread:$0]  %s317_s0, 512, %s22_s10, [#allocation3], %s289_s12, %s289_s12, %s290_s13  }
   0xe   :  { %s291_s16 = smov [#allocation5]  }
   0xf   :  { %s39_s17 = sshll.u32 %s291_s16, 4  ;;  %s40_s17 = int_to_ptr.vmem [resolvable:$true] %s39_s17 }
  0x10   :  { %s250_s18 = scalar_lea.vmem %s40_s17, 512  ;;  %p255_p6 = scmp.lt.s32.totalorder %s40_s17, %s40_s17 }
  0x11   :  { %p251_p5 = scmp.ne.s32.totalorder %s40_s17, %s250_s18  ;;  %p256_p7 = scmp.lt.s32.totalorder %s250_s18, %s250_s18 }
  0x13   :  { %p257_p8 = por %p256_p7, %p255_p6 }
  0x15   :  { %p258_p9 = pnand %p257_p8, %p251_p5 }
  0x17   :  { %261 = shalt.err (!%p258_p9)
}
  0x18   :  { %45 = dma.hbm_to_vmem [thread:$0]  %s318_s1, 512, %s40_s17, [#allocation6], %s289_s12, %s289_s12, %s290_s13  }
  0x19   :  { %282 = dma.done.wait [#allocation3], 512  }
  0x1a   :  { %283 = vsyncadd [#allocation3], 4294966784 }
  0x1b   :  { %284 = dma.done.wait [#allocation6], 512  }
  0x1c   :  { %285 = vsyncadd [#allocation6], 4294966784  ;;  %v74_v0 = vld [vmem:[#allocation2] sm:$0xff]  ;;  %v79_v2 = vld [vmem:[#allocation5 + $0x8] sm:$0xff]  ;;  %s292_s0 = smov [#allocation7]  }
  0x1d   :  { %v78_v1 = vld [vmem:[#allocation5] sm:$0xff]  ;;  %206 = vlog2.f32 %v74_v0  ;;  %v80_v3 = vld [vmem:[#allocation5 + $0x10] sm:$0xff]  ;;  %v81_v4 = vld [vmem:[#allocation5 + $0x18] sm:$0xff]  ;;  %s186_s1 = sshll.u32 %s292_s0, 4  ;;  %s187_s1 = int_to_ptr.vmem [resolvable:$true] %s186_s1 }
  0x1e   :  { %208 = vlog2.f32 %v78_v1  ;;  %v75_v5 = vld [vmem:[#allocation2 + $0x8] sm:$0xff]  ;;  %v76_v6 = vld [vmem:[#allocation2 + $0x10] sm:$0xff]  ;;  %v77_v7 = vld [vmem:[#allocation2 + $0x18] sm:$0xff]  ;;  %s262_s21 = scalar_lea.vmem %s187_s1, 128  ;;  %p267_p11 = scmp.lt.s32.totalorder %s187_s1, %s187_s1 }
  0x1f   :  { %210 = vlog2.f32 %v79_v2  ;;  %p263_p10 = scmp.ne.s32.totalorder %s187_s1, %s262_s21  ;;  %p268_p12 = scmp.lt.s32.totalorder %s262_s21, %s262_s21 }
  0x20   :  { %212 = vlog2.f32 %v80_v3 }
  0x21   :  { %214 = vlog2.f32 %v81_v4  ;;  %p269_p13 = por %p268_p12, %p267_p11 }
  0x22   :  { %216 = vlog2.f32 %v75_v5 }
  0x23   :  { %218 = vlog2.f32 %v76_v6  ;;  %p270_p0 = pnand %p269_p13, %p263_p10 }
  0x24   :  { %220 = vlog2.f32 %v77_v7 }
  0x2a   :  { %v207_v8 = vpop.eup %206 }
  0x2b   :  { %v209_v9 = vpop.eup %208  ;;  %v91_v10 = vmul.f32 0.6931472, %v207_v8 }
  0x2c   :  { %v211_v11 = vpop.eup %210  ;;  %v83_v12 = vmul.f32 0.6931472, %v209_v9 }
  0x2d   :  { %v213_v13 = vpop.eup %212  ;;  %v85_v15 = vmul.f32 0.6931472, %v211_v11 }
  0x2e   :  { %v215_v14 = vpop.eup %214  ;;  %v98_v16 = vsub.f32 %v83_v12, %v91_v10  ;;  %v87_v18 = vmul.f32 0.6931472, %v213_v13 }
  0x2f   :  { %v217_v17 = vpop.eup %216  ;;  %v89_v20 = vmul.f32 0.6931472, %v215_v14 }
  0x30   :  { %v219_v19 = vpop.eup %218  ;;  %v93_v21 = vmul.f32 0.6931472, %v217_v17  ;;  %v102_v26 = vand.u32 2147483647, %v98_v16 }
  0x31   :  { %v221_v22 = vpop.eup %220  ;;  %v95_v23 = vmul.f32 0.6931472, %v219_v19 }
  0x32   :  { %v97_v24 = vmul.f32 0.6931472, %v221_v22  ;;  %v99_v25 = vsub.f32 %v85_v15, %v93_v21 }
  0x33   :  { %v100_v27 = vsub.f32 %v87_v18, %v95_v23 }
  0x34   :  { %v101_v28 = vsub.f32 %v89_v20, %v97_v24  ;;  %v103_v29 = vand.u32 2147483647, %v99_v25 }
  0x35   :  { %v104_v30 = vand.u32 2147483647, %v100_v27 }
  0x36   :  { %v105_v31 = vand.u32 2147483647, %v101_v28  ;;  %v107_v32 = vadd.f32 %v103_v29, %v102_v26 }
  0x38   :  { %v108_v33 = vadd.f32 %v107_v32, %v104_v30 }
  0x3a   :  { %v109_v34 = vadd.f32 %v108_v33, %v105_v31 }
  0x3c   :  { %111 = vst [vmem:[#allocation7] sm:$0xff] %v109_v34 }
  0x3d   :  { %273 = shalt.err (!%p270_p0)
}
  0x3e   :  { %189 = dma.vmem_to_hbm [thread:$0]  %s187_s1, 128, %s319_s2, [#allocation4]  }
  0x3f   :  { %286 = dma.done.wait [#allocation4], 128  }
  0x40   :  { %287 = vsyncadd [#allocation4], 4294967168 }
  0x41   :  { %193 = vsyncpa [#allocation3], 1 }
  0x42   :  { %194 = vsyncpa [#allocation6], 1 }
  0x43   :  { %195 = vsyncpa [#allocation4], 1 }

</bundles_post_ra>
